<compile_context>
chip_gen: v6e
topology: v6e:2x2x1
jax: 0.10.0
libtpu: 0.0.40
codegen_flags: <defaults>
</compile_context>

<pallas_src>
import jax
import jax.numpy as jnp
from jax.experimental import pallas as pl
from jax.experimental.pallas import tpu as pltpu


# ----------------------------------------------------------------------------
# Sinusoid table (mirrors PositionalEncoding.__init__, a non-trainable buffer)
# ----------------------------------------------------------------------------
def make_sinusoid_encoding(max_len, d_model):
    pos = jnp.arange(max_len, dtype=jnp.float32)[:, None]            # (max_len, 1)
    i2 = jnp.arange(0, d_model, 2, dtype=jnp.float32)                # (d_model/2,)
    ang = pos / jnp.power(10000.0, i2 / d_model)                     # (max_len, d/2)
    pe = jnp.zeros((max_len, d_model), jnp.float32)
    pe = pe.at[:, 0::2].set(jnp.sin(ang))
    pe = pe.at[:, 1::2].set(jnp.cos(ang))
    return pe


# ----------------------------------------------------------------------------
# Pallas kernel: per-batch fused broadcast add (everything stays in VMEM)
# ----------------------------------------------------------------------------
def _pos_enc_kernel(x_ref, pe_ref, o_ref):
    # x_ref: (1, L, D) tile for this batch element, pe_ref: (L, D) shared table.
    o_ref[0] = (x_ref[0] + pe_ref[...]).astype(o_ref.dtype)


def positional_encoding(x, encoding):
    """x: (B, L, D); encoding: (max_len, D) with max_len >= L.  Returns x + PE."""
    B, L, D = x.shape
    pe = encoding[:L, :].astype(jnp.float32)   # encoding[:x.size(1), :]
    return pl.pallas_call(
        _pos_enc_kernel,
        out_shape=jax.ShapeDtypeStruct((B, L, D), x.dtype),
        grid=(B,),
        in_specs=[
            pl.BlockSpec((1, L, D), lambda b: (b, 0, 0)),   # this batch element
            pl.BlockSpec((L, D), lambda b: (0, 0)),         # shared PE table
        ],
        out_specs=pl.BlockSpec((1, L, D), lambda b: (b, 0, 0)),
        compiler_params=pltpu.CompilerParams(
            # batch axis is independent -> megacore-shardable on v7x
            dimension_semantics=("parallel",)),
    )(x, pe)


# ----------------------------------------------------------------------------
if __name__ == "__main__":
    key = jax.random.PRNGKey(0)

    # Small shapes consistent with the module: (batch, seq_len, d_model),
    # seq_len < max_len exercises the encoding[:x.size(1)] slice,
    # d_model = 128 keeps the output lane-dense (full 128-wide stores).
    B, L, D, MAX_LEN = 4, 12, 128, 16
    x = jax.random.normal(key, (B, L, D), jnp.float32)
    encoding = make_sinusoid_encoding(MAX_LEN, D)

    fwd = jax.jit(positional_encoding)
    y = fwd(x, encoding)
    jax.block_until_ready(y)

    # Correctness check against the plain-JAX reference of the PyTorch forward.
    ref = x + encoding[:L, :][None, :, :]
    assert y.shape == (B, L, D)
    assert jnp.allclose(y, ref, atol=1e-6, rtol=1e-6)

    print("KERNEL_OK")
</pallas_src>

<mosaic_0001>
module attributes {stable_mosaic.version = 11 : i64} {
  func.func @_pos_enc_kernel(%arg0: i32, %arg1: memref<1x12x128xf32, #tpu.memory_space<vmem>>, %arg2: memref<12x128xf32, #tpu.memory_space<vmem>>, %arg3: memref<1x12x128xf32, #tpu.memory_space<vmem>>) attributes {dimension_semantics = [#tpu.dimension_semantics<parallel>], iteration_bounds = array<i64: 4>, scalar_prefetch = 0 : i64, scratch_operands = 0 : i64, tpu.core_type = #tpu.core_type<tc>, window_params = [{transform_indices = @transform_0, window_bounds = array<i64: 1, 12, 128>}, {pipeline_mode = #tpu.pipeline_mode<synchronous>, transform_indices = @transform_1, window_bounds = array<i64: 12, 128>}, {transform_indices = @transform_2, window_bounds = array<i64: 1, 12, 128>}]} {
    %c0 = arith.constant 0 : index
    %c0_0 = arith.constant 0 : index
    %c0_1 = arith.constant 0 : index
    %0 = vector.load %arg1[%c0, %c0_0, %c0_1] : memref<1x12x128xf32, #tpu.memory_space<vmem>>, vector<1x12x128xf32>
    %1 = vector.shape_cast %0 : vector<1x12x128xf32> to vector<12x128xf32>
    %c0_2 = arith.constant 0 : index
    %c0_3 = arith.constant 0 : index
    %2 = vector.load %arg2[%c0_2, %c0_3] : memref<12x128xf32, #tpu.memory_space<vmem>>, vector<12x128xf32>
    %3 = arith.addf %1, %2 : vector<12x128xf32>
    %c0_4 = arith.constant 0 : index
    %c0_5 = arith.constant 0 : index
    %c0_6 = arith.constant 0 : index
    %4 = vector.load %arg3[%c0_4, %c0_5, %c0_6] : memref<1x12x128xf32, #tpu.memory_space<vmem>>, vector<1x12x128xf32>
    %5 = vector.shape_cast %4 : vector<1x12x128xf32> to vector<12x128xf32>
    %6 = vector.shape_cast %3 : vector<12x128xf32> to vector<1x12x128xf32>
    tpu.vector_store %arg3[%c0_4, %c0_5, %c0_6], %6 {strides = array<i32>} : memref<1x12x128xf32, #tpu.memory_space<vmem>>, vector<1x12x128xf32>,
    return
  }
  func.func @transform_0(%arg0: i32) -> (i32, i32, i32) {
    %c0_i32 = arith.constant 0 : i32
    %c0_i32_0 = arith.constant 0 : i32
    %c0_i32_1 = arith.constant 0 : i32
    return %arg0, %c0_i32, %c0_i32_0 : i32, i32, i32
  }
  func.func @transform_1(%arg0: i32) -> (i32, i32) {
    %c0_i32 = arith.constant 0 : i32
    %c0_i32_0 = arith.constant 0 : i32
    %c0_i32_1 = arith.constant 0 : i32
    return %c0_i32, %c0_i32_0 : i32, i32
  }
  func.func @transform_2(%arg0: i32) -> (i32, i32, i32) {
    %c0_i32 = arith.constant 0 : i32
    %c0_i32_0 = arith.constant 0 : i32
    %c0_i32_1 = arith.constant 0 : i32
    return %arg0, %c0_i32, %c0_i32_0 : i32, i32, i32
  }
}

</mosaic_0001>

<bundles_post_ra>
// kernel: positional_encoding.1
= control target key start
LH: loop header
LB: loop body
LE: loop exit
PB: predicated region body
PF: predicated region fallthrough
CT: control target
= control target key end

     0   :  { %s232_s9 = smov 0   ;;  %s263_s0 = inlined_call_operand.vmem [shape: f32[4,12,128], index: 0, kind: input, shape index: {}]   ;;  %s264_s1 = inlined_call_operand.vmem [shape: f32[12,128], index: 1, kind: input, shape index: {}]   ;;  %s265_s2 = inlined_call_operand.vmem [shape: f32[4,12,128], index: 2, kind: output, shape index: {}]  }
   0x1 LB: > { %s207_s10 = sadd.s32 4294967295, %s234_s9   ;;  %p211_p0 = scmp.ge.s32.totalorder %s234_s9, 1  ;;  %s234_s9 = sphi %s232_s9, %s12_s9  }
   0x2   : > { %p112_p1 = scmp.lt.s32.totalorder %s234_s9, 5 }
   0x4   : > { %p113_p2 = pnand %p211_p0, %p112_p1 }
   0x5   : > { %p134_p3 = scmp.lt.s32.totalorder (!%p113_p2), %s207_s10, 3 }
   0x6   : > { %116 = sbr.rel (%p113_p2) target bundleno = 18 (0x12), region = 28 }
   0xb   : > { %s267_s10 = smov (!%p134_p3, %s207_s10), 3  ;;  %v146_v0 = vld [vmem:[%s264_s1] sm:$0xff]  ;;  %v147_v1 = vld [vmem:[%s264_s1 + $0x8] sm:$0xf] }
   0xc   : > { %s218_s11 = sshll.u32 %s267_s10, 4 }
   0xd   : > { %s138_s18 = scalar_lea.vmem %s263_s0, %s218_s11  ;;  %s143_s21 = scalar_lea.vmem %s265_s2, %s218_s11 }
   0xe   : > { %v144_v2 = vld [vmem:[%s138_s18] sm:$0xff]  ;;  %v145_v3 = vld [vmem:[%s138_s18 + $0x8] sm:$0xf] }
   0xf   : > { %v148_v4 = vadd.f32 %v146_v0, %v144_v2  ;;  %v149_v5 = vadd.f32 %v147_v1, %v145_v3 }
  0x11   : > { %150 = vst [vmem:[%s143_s21] sm:$0xff] %v148_v4  ;;  %151 = vst [vmem:[%s143_s21 + $0x8] sm:$0xf] %v149_v5 }
  0x12 PF: > { %s12_s9 = sadd.s32 1, %s234_s9  }
  0x13   : > { %p9_p4 = scmp.ge.s32.totalorder %s12_s9, 6  }
  0x15   :  { %11 = sbr.rel (!%p9_p4) target bundleno = 1 (0x1), region = 58 }

</bundles_post_ra>
